<compile_context>
chip_gen: v7x
topology: tpu7x:2x2x1
jax: 0.10.0
libtpu: 0.0.40
codegen_flags: <defaults>
</compile_context>

<pallas_src>
import jax
import jax.numpy as jnp
from jax.experimental import pallas as pl
from jax.experimental.pallas import tpu as pltpu

INPUT_DIM = 440
H1 = 256
H2 = 128
OUT_DIM = 44
OUT_PAD = 128      # 44 -> 128: full lane tile -> unmasked, lane-dense stores
TB_MAX = 1024      # max batch tile (fits easily in scoped VMEM on v5e/v6e/v7x)
MIN_BLOCKS = 4     # keep >= 4 grid blocks at large B so v7x's 2 TCs both get work


def _round_up(n, m):
    return (n + m - 1) // m * m


def _choose_tile(b):
    """Batch tile: multiple of 8 sublanes, as large as possible, but >=MIN_BLOCKS blocks."""
    return min(TB_MAX, max(8, _round_up(pl.cdiv(b, MIN_BLOCKS), 8)))


def _mlp_kernel(x_ref, w1_ref, b1_ref, w2_ref, b2_ref, w3_ref, b3_ref, o_ref):
    # fc1 + relu: bf16 MXU operands, f32 accumulation, f32 bias/relu on the VPU.
    x = x_ref[...]                                       # bf16 [tb, 440]
    h1 = jnp.dot(x, w1_ref[...], preferred_element_type=jnp.float32) + b1_ref[...]
    h1 = jnp.maximum(h1, 0.0)
    # fc2 + relu
    h2 = jnp.dot(h1.astype(jnp.bfloat16), w2_ref[...],
                 preferred_element_type=jnp.float32) + b2_ref[...]
    h2 = jnp.maximum(h2, 0.0)
    # fc3 (no activation), output lanes padded to 128
    out = jnp.dot(h2.astype(jnp.bfloat16), w3_ref[...],
                  preferred_element_type=jnp.float32) + b3_ref[...]
    o_ref[...] = out.astype(o_ref.dtype)


def init_params(key):
    """f32 params matching nn.Linear's uniform(-1/sqrt(fan_in)) init; W stored [in, out]."""
    ks = jax.random.split(key, 6)

    def linear(kw, kb, fan_in, fan_out):
        bound = 1.0 / jnp.sqrt(jnp.float32(fan_in))
        w = jax.random.uniform(kw, (fan_in, fan_out), jnp.float32, -bound, bound)
        b = jax.random.uniform(kb, (1, fan_out), jnp.float32, -bound, bound)
        return w, b

    w1, b1 = linear(ks[0], ks[1], INPUT_DIM, H1)
    w2, b2 = linear(ks[2], ks[3], H1, H2)
    w3, b3 = linear(ks[4], ks[5], H2, OUT_DIM)
    return {"w1": w1, "b1": b1, "w2": w2, "b2": b2, "w3": w3, "b3": b3}


def prepare_params(params):
    """One-time layout prep: zero-pad OUT 44->128 (lane-dense stores), cast weights to bf16.

    No K padding anymore: w1 stays [440, 256].
    """
    w3 = jnp.zeros((H2, OUT_PAD), jnp.float32).at[:, :OUT_DIM].set(params["w3"])
    b3 = jnp.zeros((1, OUT_PAD), jnp.float32).at[:, :OUT_DIM].set(params["b3"])
    return {
        "w1": params["w1"].astype(jnp.bfloat16),   # [440, 256]
        "b1": params["b1"],                        # [1, 256] f32
        "w2": params["w2"].astype(jnp.bfloat16),   # [256, 128]
        "b2": params["b2"],                        # [1, 128] f32
        "w3": w3.astype(jnp.bfloat16),             # [128, 128] (out-padded)
        "b3": b3,                                  # [1, 128]  (out-padded)
    }


def fc_predict_network(x, prepared):
    """x: [B, 440] (bf16 preferred; f32 is cast), prepared: prepare_params output.

    Returns [B, 44] f32.
    """
    B = x.shape[0]
    if x.dtype != jnp.bfloat16:
        # Ideally the producer already emits bf16; under jit this cast fuses upstream.
        x = x.astype(jnp.bfloat16)

    tb = _choose_tile(B)
    grid = (pl.cdiv(B, tb),)            # ragged last block is masked by Pallas

    const = lambda i: (0, 0)            # weights/biases: resident, DMA'd once
    weight_bytes = (INPUT_DIM * H1 + H1 * H2 + H2 * OUT_PAD) * 2   # bf16
    bias_bytes = (H1 + H2 + OUT_PAD) * 4
    cost = pl.CostEstimate(
        flops=2 * B * (INPUT_DIM * H1 + H1 * H2 + H2 * OUT_PAD),
        transcendentals=0,
        bytes_accessed=B * INPUT_DIM * 2 + B * OUT_PAD * 4 + weight_bytes + bias_bytes,
    )

    out = pl.pallas_call(
        _mlp_kernel,
        out_shape=jax.ShapeDtypeStruct((B, OUT_PAD), jnp.float32),
        grid=grid,
        in_specs=[
            pl.BlockSpec((tb, INPUT_DIM), lambda i: (i, 0)),  # x: batch-tiled, pipelined
            pl.BlockSpec((INPUT_DIM, H1), const),             # w1 (bf16, resident)
            pl.BlockSpec((1, H1), const),                     # b1 (f32)
            pl.BlockSpec((H1, H2), const),                    # w2
            pl.BlockSpec((1, H2), const),                     # b2
            pl.BlockSpec((H2, OUT_PAD), const),               # w3 (out-padded)
            pl.BlockSpec((1, OUT_PAD), const),                # b3 (out-padded)
        ],
        out_specs=pl.BlockSpec((tb, OUT_PAD), lambda i: (i, 0)),
        compiler_params=pltpu.CompilerParams(
            dimension_semantics=("parallel",)),               # shards batch across TCs on v7x
        cost_estimate=cost,
    )(x, prepared["w1"], prepared["b1"], prepared["w2"], prepared["b2"],
      prepared["w3"], prepared["b3"])

    # The consumer can also take the padded [B, 128] block and slice lazily; we
    # materialize [B, 44] here to match the module's contract.
    return out[:, :OUT_DIM]


def _reference_f32(x, p):
    """Pure f32 reference (matches the PyTorch module exactly)."""
    h1 = jnp.maximum(x @ p["w1"] + p["b1"], 0.0)
    h2 = jnp.maximum(h1 @ p["w2"] + p["b2"], 0.0)
    return h2 @ p["w3"] + p["b3"]


def _reference_bf16w(x, p):
    """Reference with the same bf16 operand quantization + f32 accumulation as the kernel."""
    def lin(a, w, b):
        return jnp.dot(a.astype(jnp.bfloat16).astype(jnp.float32),
                       w.astype(jnp.bfloat16).astype(jnp.float32),
                       preferred_element_type=jnp.float32) + b
    h1 = jnp.maximum(lin(x, p["w1"], p["b1"]), 0.0)
    h2 = jnp.maximum(lin(h1, p["w2"], p["b2"]), 0.0)
    return lin(h2, p["w3"], p["b3"])


if __name__ == "__main__":
    key = jax.random.PRNGKey(0)
    kx, kp, kx2 = jax.random.split(key, 3)

    params = init_params(kp)
    prepared = prepare_params(params)

    # Small, sublane-aligned batch.
    B = 8
    x = jax.random.normal(kx, (B, INPUT_DIM), jnp.float32)
    out = jax.block_until_ready(fc_predict_network(x, prepared))
    assert out.shape == (B, OUT_DIM)

    # Exact-path check: same bf16 operand quantization, f32 accumulation.
    ref_q = _reference_bf16w(x, params)
    assert jnp.allclose(out, ref_q, atol=2e-3, rtol=2e-3)
    # Semantic check vs the full-f32 PyTorch-equivalent forward (bf16 tolerance).
    ref = _reference_f32(x, params)
    assert jnp.allclose(out, ref, atol=5e-2, rtol=5e-2)

    # Ragged batch (B not a multiple of the tile): exercises the masked last block.
    B2 = 20
    x2 = jax.random.normal(kx2, (B2, INPUT_DIM), jnp.float32)
    out2 = jax.block_until_ready(fc_predict_network(x2, prepared))
    assert out2.shape == (B2, OUT_DIM)
    assert jnp.allclose(out2, _reference_bf16w(x2, params), atol=2e-3, rtol=2e-3)

    print("KERNEL_OK")
</pallas_src>

<mosaic_0001>
module attributes {stable_mosaic.version = 11 : i64} {
  func.func @_mlp_kernel(%arg0: i32, %arg1: memref<8x440xbf16, #tpu.memory_space<vmem>>, %arg2: memref<440x256xbf16, #tpu.memory_space<vmem>>, %arg3: memref<1x256xf32, #tpu.memory_space<vmem>>, %arg4: memref<256x128xbf16, #tpu.memory_space<vmem>>, %arg5: memref<1x128xf32, #tpu.memory_space<vmem>>, %arg6: memref<128x128xbf16, #tpu.memory_space<vmem>>, %arg7: memref<1x128xf32, #tpu.memory_space<vmem>>, %arg8: memref<8x128xf32, #tpu.memory_space<vmem>>) attributes {dimension_semantics = [#tpu.dimension_semantics<parallel>], iteration_bounds = array<i64: 1>, scalar_prefetch = 0 : i64, scratch_operands = 0 : i64, tpu.core_type = #tpu.core_type<tc>, window_params = [{transform_indices = @transform_0, window_bounds = array<i64: 8, 440>}, {pipeline_mode = #tpu.pipeline_mode<synchronous>, transform_indices = @transform_1, window_bounds = array<i64: 440, 256>}, {pipeline_mode = #tpu.pipeline_mode<synchronous>, transform_indices = @transform_2, window_bounds = array<i64: 1, 256>}, {pipeline_mode = #tpu.pipeline_mode<synchronous>, transform_indices = @transform_3, window_bounds = array<i64: 256, 128>}, {pipeline_mode = #tpu.pipeline_mode<synchronous>, transform_indices = @transform_4, window_bounds = array<i64: 1, 128>}, {pipeline_mode = #tpu.pipeline_mode<synchronous>, transform_indices = @transform_5, window_bounds = array<i64: 128, 128>}, {pipeline_mode = #tpu.pipeline_mode<synchronous>, transform_indices = @transform_6, window_bounds = array<i64: 1, 128>}, {transform_indices = @transform_7, window_bounds = array<i64: 8, 128>}]} {
    %c0 = arith.constant 0 : index
    %c0_0 = arith.constant 0 : index
    %0 = vector.load %arg1[%c0, %c0_0] : memref<8x440xbf16, #tpu.memory_space<vmem>>, vector<8x440xbf16>
    %c0_1 = arith.constant 0 : index
    %c0_2 = arith.constant 0 : index
    %1 = vector.load %arg2[%c0_1, %c0_2] : memref<440x256xbf16, #tpu.memory_space<vmem>>, vector<440x256xbf16>
    %cst = arith.constant dense<0.000000e+00> : vector<8x256xf32>
    %2 = tpu.matmul %0, %1, %cst {dimension_numbers = #tpu.dot_dimension_numbers<[1], [0], [0], [1], [0, 0, 1, 1], [], []>} : vector<8x440xbf16>, vector<440x256xbf16>, vector<8x256xf32> -> vector<8x256xf32>
    %c0_3 = arith.constant 0 : index
    %c0_4 = arith.constant 0 : index
    %3 = vector.load %arg3[%c0_3, %c0_4] : memref<1x256xf32, #tpu.memory_space<vmem>>, vector<1x256xf32>
    %4 = vector.broadcast %3 : vector<1x256xf32> to vector<8x256xf32>
    %5 = arith.addf %2, %4 : vector<8x256xf32>
    %cst_5 = arith.constant 0.000000e+00 : f32
    %6 = vector.broadcast %cst_5 : f32 to vector<8x256xf32>
    %7 = arith.maximumf %5, %6 : vector<8x256xf32>
    %8 = arith.truncf %7 : vector<8x256xf32> to vector<8x256xbf16>
    %c0_6 = arith.constant 0 : index
    %c0_7 = arith.constant 0 : index
    %9 = vector.load %arg4[%c0_6, %c0_7] : memref<256x128xbf16, #tpu.memory_space<vmem>>, vector<256x128xbf16>
    %cst_8 = arith.constant dense<0.000000e+00> : vector<8x128xf32>
    %10 = tpu.matmul %8, %9, %cst_8 {dimension_numbers = #tpu.dot_dimension_numbers<[1], [0], [0], [1], [0, 0, 1, 1], [], []>} : vector<8x256xbf16>, vector<256x128xbf16>, vector<8x128xf32> -> vector<8x128xf32>
    %c0_9 = arith.constant 0 : index
    %c0_10 = arith.constant 0 : index
    %11 = vector.load %arg5[%c0_9, %c0_10] : memref<1x128xf32, #tpu.memory_space<vmem>>, vector<1x128xf32>
    %12 = vector.broadcast %11 : vector<1x128xf32> to vector<8x128xf32>
    %13 = arith.addf %10, %12 : vector<8x128xf32>
    %cst_11 = arith.constant 0.000000e+00 : f32
    %14 = vector.broadcast %cst_11 : f32 to vector<8x128xf32>
    %15 = arith.maximumf %13, %14 : vector<8x128xf32>
    %16 = arith.truncf %15 : vector<8x128xf32> to vector<8x128xbf16>
    %c0_12 = arith.constant 0 : index
    %c0_13 = arith.constant 0 : index
    %17 = vector.load %arg6[%c0_12, %c0_13] : memref<128x128xbf16, #tpu.memory_space<vmem>>, vector<128x128xbf16>
    %cst_14 = arith.constant dense<0.000000e+00> : vector<8x128xf32>
    %18 = tpu.matmul %16, %17, %cst_14 {dimension_numbers = #tpu.dot_dimension_numbers<[1], [0], [0], [1], [0, 0, 1, 1], [], []>} : vector<8x128xbf16>, vector<128x128xbf16>, vector<8x128xf32> -> vector<8x128xf32>
    %c0_15 = arith.constant 0 : index
    %c0_16 = arith.constant 0 : index
    %19 = vector.load %arg7[%c0_15, %c0_16] : memref<1x128xf32, #tpu.memory_space<vmem>>, vector<1x128xf32>
    %20 = vector.broadcast %19 : vector<1x128xf32> to vector<8x128xf32>
    %21 = arith.addf %18, %20 : vector<8x128xf32>
    %c0_17 = arith.constant 0 : index
    %c0_18 = arith.constant 0 : index
    %22 = vector.load %arg8[%c0_17, %c0_18] : memref<8x128xf32, #tpu.memory_space<vmem>>, vector<8x128xf32>
    tpu.vector_store %arg8[%c0_17, %c0_18], %21 {strides = array<i32>} : memref<8x128xf32, #tpu.memory_space<vmem>>, vector<8x128xf32>,
    return
  }
  func.func @transform_0(%arg0: i32) -> (i32, i32) {
    %c0_i32 = arith.constant 0 : i32
    %c0_i32_0 = arith.constant 0 : i32
    return %arg0, %c0_i32 : i32, i32
  }
  func.func @transform_1(%arg0: i32) -> (i32, i32) {
    %c0_i32 = arith.constant 0 : i32
    %c0_i32_0 = arith.constant 0 : i32
    %c0_i32_1 = arith.constant 0 : i32
    return %c0_i32, %c0_i32_0 : i32, i32
  }
  func.func @transform_2(%arg0: i32) -> (i32, i32) {
    %c0_i32 = arith.constant 0 : i32
    %c0_i32_0 = arith.constant 0 : i32
    %c0_i32_1 = arith.constant 0 : i32
    return %c0_i32, %c0_i32_0 : i32, i32
  }
  func.func @transform_3(%arg0: i32) -> (i32, i32) {
    %c0_i32 = arith.constant 0 : i32
    %c0_i32_0 = arith.constant 0 : i32
    %c0_i32_1 = arith.constant 0 : i32
    return %c0_i32, %c0_i32_0 : i32, i32
  }
  func.func @transform_4(%arg0: i32) -> (i32, i32) {
    %c0_i32 = arith.constant 0 : i32
    %c0_i32_0 = arith.constant 0 : i32
    %c0_i32_1 = arith.constant 0 : i32
    return %c0_i32, %c0_i32_0 : i32, i32
  }
  func.func @transform_5(%arg0: i32) -> (i32, i32) {
    %c0_i32 = arith.constant 0 : i32
    %c0_i32_0 = arith.constant 0 : i32
    %c0_i32_1 = arith.constant 0 : i32
    return %c0_i32, %c0_i32_0 : i32, i32
  }
  func.func @transform_6(%arg0: i32) -> (i32, i32) {
    %c0_i32 = arith.constant 0 : i32
    %c0_i32_0 = arith.constant 0 : i32
    %c0_i32_1 = arith.constant 0 : i32
    return %c0_i32, %c0_i32_0 : i32, i32
  }
  func.func @transform_7(%arg0: i32) -> (i32, i32) {
    %c0_i32 = arith.constant 0 : i32
    %c0_i32_0 = arith.constant 0 : i32
    return %arg0, %c0_i32 : i32, i32
  }
}

</mosaic_0001>

<bundles_post_ra>
// kernel: tpu_custom_call.1
= control target key start
LH: loop header
LB: loop body
LE: loop exit
PB: predicated region body
PF: predicated region fallthrough
CT: control target
= control target key end

     0   :  { %12 = vsyncpa [#allocation3], 0  ;;  %s1352_s0 = inlined_call_operand.hbm [shape: bf16[8,440], index: 0, kind: input, shape index: {}]   ;;  %s1353_s1 = inlined_call_operand.hbm [shape: bf16[440,256], index: 1, kind: input, shape index: {}]   ;;  %s1354_s2 = inlined_call_operand.vmem [shape: f32[1,256], index: 2, kind: input, shape index: {}]   ;;  %s1355_s3 = inlined_call_operand.hbm [shape: bf16[256,128], index: 3, kind: input, shape index: {}]   ;;  %s1356_s4 = inlined_call_operand.vmem [shape: f32[1,128], index: 4, kind: input, shape index: {}]   ;;  %s1357_s5 = inlined_call_operand.hbm [shape: bf16[128,128], index: 5, kind: input, shape index: {}]   ;;  %s1358_s6 = inlined_call_operand.vmem [shape: f32[1,128], index: 6, kind: input, shape index: {}]   ;;  %s1359_s7 = inlined_call_operand.hbm [shape: f32[8,128], index: 7, kind: output, shape index: {}]  }
   0x1   :  { %13 = vsyncpa [#allocation6], 0 }
   0x2   :  { %14 = vsyncpa [#allocation9], 0 }
   0x3   :  { %15 = vsyncpa [#allocation4], 0  ;;  %s1226_s24 = smov [#allocation5]   ;;  %s1108_s28 = scalar_lea.hbm %s1353_s1, 7040 }
   0x4   :  { %s31_s25 = sshll.u32 %s1226_s24, 4  ;;  %p1109_p0 = scmp.ne.s32.totalorder %s1353_s1, %s1108_s28  ;;  %s32_s25 = int_to_ptr.vmem [resolvable:$true] %s31_s25 }
   0x5   :  { %p1112_p1 = scmp.lt.u32.totalorder %s1108_s28, %s1353_s1 }
   0x7   :  { %p1114_p2 = pnand %p1112_p1, %p1109_p0 }
   0x9   :  { %1117 = shalt.err (!%p1114_p2)
}
   0xa   :  { %s1118_s10 = scalar_lea.vmem %s32_s25, 7040  ;;  %p1123_p4 = scmp.lt.s32.totalorder %s32_s25, %s32_s25 }
   0xb   :  { %p1119_p3 = scmp.ne.s32.totalorder %s32_s25, %s1118_s10  ;;  %p1124_p5 = scmp.lt.s32.totalorder %s1118_s10, %s1118_s10 }
   0xd   :  { %p1125_p6 = por %p1124_p5, %p1123_p4 }
   0xf   :  { %p1126_p7 = pnand %p1125_p6, %p1119_p3 }
  0x11   :  { %1129 = shalt.err (!%p1126_p7)
}
  0x12   :  { %s1227_s11 = smov 128   ;;  %s1228_s12 = smov 8  }
  0x13   :  { %37 = dma.hbm_to_vmem [thread:$0]  %s1353_s1, 7040, %s32_s25, [#allocation6], %s1227_s11, %s1227_s11, %s1228_s12  }
  0x14   :  { %s1229_s15 = smov [#allocation2]   ;;  %s1230_s17 = smov [#allocation7]  }
  0x15   :  { %s22_s16 = sshll.u32 %s1229_s15, 4  ;;  %s45_s18 = sshll.u32 %s1230_s17, 4  ;;  %s23_s16 = int_to_ptr.vmem [resolvable:$true] %s22_s16  ;;  %s46_s18 = int_to_ptr.vmem [resolvable:$true] %s45_s18 }
  0x16   :  { %s1130_s21 = scalar_lea.hbm %s1352_s0, 256 }
  0x17   :  { %p1131_p8 = scmp.ne.s32.totalorder %s1352_s0, %s1130_s21  ;;  %p1134_p9 = scmp.lt.u32.totalorder %s1130_s21, %s1352_s0 }
  0x19   :  { %p1136_p10 = pnand %p1134_p9, %p1131_p8 }
  0x1b   :  { %1139 = shalt.err (!%p1136_p10)
}
  0x1c   :  { %s1140_s1 = scalar_lea.vmem %s23_s16, 256  ;;  %p1145_p12 = scmp.lt.s32.totalorder %s23_s16, %s23_s16 }
  0x1d   :  { %p1141_p11 = scmp.ne.s32.totalorder %s23_s16, %s1140_s1  ;;  %p1146_p13 = scmp.lt.s32.totalorder %s1140_s1, %s1140_s1 }
  0x1f   :  { %p1147_p0 = por %p1146_p13, %p1145_p12 }
  0x21   :  { %p1148_p1 = pnand %p1147_p0, %p1141_p11 }
  0x23   :  { %1151 = shalt.err (!%p1148_p1)
}
  0x24   :  { %25 = dma.hbm_to_vmem [thread:$0]  %s1352_s0, 256, %s23_s16, [#allocation3]  }
  0x25   :  { %s1152_s30 = scalar_lea.hbm %s1355_s3, 2048 }
  0x26   :  { %p1153_p2 = scmp.ne.s32.totalorder %s1355_s3, %s1152_s30  ;;  %p1156_p3 = scmp.lt.u32.totalorder %s1152_s30, %s1355_s3 }
  0x28   :  { %p1158_p4 = pnand %p1156_p3, %p1153_p2 }
  0x2a   :  { %1161 = shalt.err (!%p1158_p4)
}
  0x2b   :  { %s1162_s12 = scalar_lea.vmem %s46_s18, 2048  ;;  %p1167_p6 = scmp.lt.s32.totalorder %s46_s18, %s46_s18 }
  0x2c   :  { %p1163_p5 = scmp.ne.s32.totalorder %s46_s18, %s1162_s12  ;;  %p1168_p7 = scmp.lt.s32.totalorder %s1162_s12, %s1162_s12 }
  0x2e   :  { %p1169_p8 = por %p1168_p7, %p1167_p6 }
  0x30   :  { %p1170_p9 = pnand %p1169_p8, %p1163_p5 }
  0x32   :  { %1173 = shalt.err (!%p1170_p9)
}
  0x33   :  { %s1231_s0 = smov 64   ;;  %s1232_s13 = smov 4  }
  0x34   :  { %51 = dma.hbm_to_vmem [thread:$0]  %s1355_s3, 2048, %s46_s18, [#allocation6], %s1231_s0, %s1231_s0, %s1232_s13  }
  0x35   :  { %s1233_s16 = smov [#allocation8]   ;;  %s1174_s21 = scalar_lea.hbm %s1357_s5, 1024 }
  0x36   :  { %s59_s17 = sshll.u32 %s1233_s16, 4  ;;  %p1175_p10 = scmp.ne.s32.totalorder %s1357_s5, %s1174_s21  ;;  %s60_s17 = int_to_ptr.vmem [resolvable:$true] %s59_s17 }
  0x37   :  { %p1178_p11 = scmp.lt.u32.totalorder %s1174_s21, %s1357_s5 }
  0x39   :  { %p1180_p12 = pnand %p1178_p11, %p1175_p10 }
  0x3b   :  { %1183 = shalt.err (!%p1180_p12)
}
  0x3c   :  { %s1184_s1 = scalar_lea.vmem %s60_s17, 1024  ;;  %p1189_p0 = scmp.lt.s32.totalorder %s60_s17, %s60_s17 }
  0x3d   :  { %p1185_p13 = scmp.ne.s32.totalorder %s60_s17, %s1184_s1  ;;  %p1190_p1 = scmp.lt.s32.totalorder %s1184_s1, %s1184_s1 }
  0x3f   :  { %p1191_p2 = por %p1190_p1, %p1189_p0 }
  0x41   :  { %p1192_p3 = pnand %p1191_p2, %p1185_p13 }
  0x43   :  { %1195 = shalt.err (!%p1192_p3)
}
  0x44   :  { %65 = dma.hbm_to_vmem [thread:$0]  %s1357_s5, 1024, %s60_s17, [#allocation9], %s1231_s0, %s1231_s0, %s1232_s13  }
  0x45   :  { %1218 = dma.done.wait [#allocation3], 256  }
  0x46   :  { %1219 = vsyncadd [#allocation3], 4294967040 }
  0x47   :  { %1220 = dma.done.wait [#allocation6], 9088  }
  0x48   :  { %1221 = vsyncadd [#allocation6], 4294958208 }
  0x49   :  { %1222 = dma.done.wait [#allocation9], 1024  }
  0x4a   :  { %1223 = vsyncadd [#allocation9], 4294966272  ;;  %v997_v0 = vld [vmem:[#allocation5 + $0x4] ss:$8 sps:$4 sm:$0xff]   ;;  %v999_v1 = vld [vmem:[#allocation5] ss:$8 sps:$4 sm:$0xff]  }
  0x4b   :  { %449 = vmatprep.subr.bf16.mxu0 %v997_v0  ;;  %v1000_v2 = vld [vmem:[#allocation5 + $0x14] ss:$8 sps:$4 sm:$0xff]   ;;  %v1002_v3 = vld [vmem:[#allocation5 + $0x10] ss:$8 sps:$4 sm:$0xff]   ;;  %v1003_v4 = vld [vmem:[#allocation5 + $0x24] ss:$8 sps:$4 sm:$0xff]  }
  0x4c   :  { %450 = vmatpush1.bf16.msra.mxu0 %v999_v1  ;;  %v1005_v5 = vld [vmem:[#allocation5 + $0x20] ss:$8 sps:$4 sm:$0xff]   ;;  %v1006_v6 = vld [vmem:[#allocation5 + $0x34] ss:$8 sps:$4 sm:$0xff]   ;;  %v1008_v7 = vld [vmem:[#allocation5 + $0x30] ss:$8 sps:$4 sm:$0xff]  }
  0x4d   :  { %451 = vmatprep.subr.bf16.mxu0 %v1000_v2  ;;  %v1009_v8 = vld [vmem:[#allocation5 + $0x44] ss:$8 sps:$4 sm:$0xff]   ;;  %v1011_v9 = vld [vmem:[#allocation5 + $0x40] ss:$8 sps:$4 sm:$0xff]   ;;  %v1012_v10 = vld [vmem:[#allocation5 + $0x54] ss:$8 sps:$4 sm:$0xff]  }
  0x4e   :  { %v1014_v11 = vld [vmem:[#allocation5 + $0x50] ss:$8 sps:$4 sm:$0xff]   ;;  %v1015_v12 = vld [vmem:[#allocation5 + $0x64] ss:$8 sps:$4 sm:$0xff]   ;;  %v1017_v15 = vld [vmem:[#allocation5 + $0x60] ss:$8 sps:$4 sm:$0xff]  }
  0x4f   :  { %v1325_v13 = vld [vmem:[#allocation2] sm:$0xff]  ;;  %v1021_v18 = vld [vmem:[#allocation5 + $0x84] ss:$8 sps:$4 sm:$0xff]   ;;  %v1023_v19 = vld [vmem:[#allocation5 + $0x80] ss:$8 sps:$4 sm:$0xff]   ;;  %vm438_vm0 = vcmask 457728  }
  0x50   :  { %452 = vmatpush1.bf16.msra.mxu0 %v1002_v3  ;;  %v842_v14 = vcombine.high %v1325_v13, %v1325_v13  ;;  %v1018_v16 = vld [vmem:[#allocation5 + $0x74] ss:$8 sps:$4 sm:$0xff]   ;;  %v1020_v17 = vld [vmem:[#allocation5 + $0x70] ss:$8 sps:$4 sm:$0xff]   ;;  %v1027_v22 = vld [vmem:[#allocation5 + $0xa4] ss:$8 sps:$4 sm:$0xff]   ;;  %v841_v48 = vcombine.low %v1325_v13, %v1325_v13 }
  0x51   :  { %453 = vmatprep.subr.bf16.mxu0 %v1003_v4  ;;  %v1024_v20 = vld [vmem:[#allocation5 + $0x94] ss:$8 sps:$4 sm:$0xff]   ;;  %v1026_v21 = vld [vmem:[#allocation5 + $0x90] ss:$8 sps:$4 sm:$0xff]   ;;  %v1029_v23 = vld [vmem:[#allocation5 + $0xa0] ss:$8 sps:$4 sm:$0xff]  }
  0x52   :  { %481 = vmatprep.mubr.bf16.mxu0 %v842_v14  ;;  %v1084_v24 = vld [vmem:[#allocation7 + $0x40] sm:$0xff]   ;;  %v1086_v27 = vld [vmem:[#allocation7 + $0x48] sm:$0xff]   ;;  %v1088_v29 = vld [vmem:[#allocation7 + $0x50] sm:$0xff]   ;;  %vm442_vm1 = vcmask 1043456   ;;  %vm1235_vm2 = vmmov 0   ;;  %s1236_s30 = smov [#allocation10]  }
  0x53   :  { %v1030_v25 = vld [vmem:[#allocation5 + $0xb4] ss:$8 sps:$4 sm:$0xff]   ;;  %929 = vmatprep.subr.bf16.mxu1 %v1084_v24  ;;  %v1087_v28 = vld [vmem:[#allocation7 + $0x8] sm:$0xff]   ;;  %v1032_v30 = vld [vmem:[#allocation5 + $0xb0] ss:$8 sps:$4 sm:$0xff]   ;;  %s830_s8 = sshll.u32 %s1236_s30, 4  ;;  %s831_s8 = int_to_ptr.vmem [resolvable:$true] %s830_s8 }
  0x54   :  { %454 = vmatpush1.bf16.msra.mxu0 %v1005_v5  ;;  %v1085_v26 = vld [vmem:[#allocation7] sm:$0xff]   ;;  %v1033_v31 = vld [vmem:[#allocation5 + $0xc4] ss:$8 sps:$4 sm:$0xff]   ;;  %v1090_v33 = vld [vmem:[#allocation7 + $0x58] sm:$0xff]   ;;  %p1201_p5 = scmp.lt.s32.totalorder %s831_s8, %s831_s8 }
  0x55   :  { %455 = vmatprep.subr.bf16.mxu0 %v1006_v6  ;;  %930 = vmatpush3.bf16.msra.mxu1 %v1085_v26  ;;  %v1089_v32 = vld [vmem:[#allocation7 + $0x10] sm:$0xff]   ;;  %v1036_v35 = vld [vmem:[#allocation5 + $0xd4] ss:$8 sps:$4 sm:$0xff]   ;;  %v1038_v37 = vld [vmem:[#allocation5 + $0xd0] ss:$8 sps:$4 sm:$0xff]  }
  0x56   :  { %931 = vmatprep.subr.bf16.mxu1 %v1086_v27  ;;  %v1035_v34 = vld [vmem:[#allocation5 + $0xc0] ss:$8 sps:$4 sm:$0xff]   ;;  %v1091_v36 = vld [vmem:[#allocation7 + $0x18] sm:$0xff]   ;;  %v1092_v38 = vld [vmem:[#allocation7 + $0x60] sm:$0xff]  }
  0x57   :  { %v1039_v39 = vld [vmem:[#allocation5 + $0xe4] ss:$8 sps:$4 sm:$0xff]   ;;  %v1093_v40 = vld [vmem:[#allocation7 + $0x20] sm:$0xff]   ;;  %v1041_v42 = vld [vmem:[#allocation5 + $0xe0] ss:$8 sps:$4 sm:$0xff]  }
  0x58   :  { %456 = vmatpush1.bf16.msra.mxu0 %v1008_v7  ;;  %v1094_v41 = vld [vmem:[#allocation7 + $0x68] sm:$0xff]   ;;  %v1042_v43 = vld [vmem:[#allocation5 + $0xf4] ss:$8 sps:$4 sm:$0xff]   ;;  %v1044_v45 = vld [vmem:[#allocation5 + $0xf0] ss:$8 sps:$4 sm:$0xff]  }
  0x59   :  { %457 = vmatprep.subr.bf16.mxu0 %v1009_v8  ;;  %932 = vmatpush3.bf16.msra.mxu1 %v1087_v28  ;;  %v1095_v44 = vld [vmem:[#allocation7 + $0x28] sm:$0xff]   ;;  %v82_v47 = vld [vmem:[#allocation2 + $0x8] sm:$0xff]  ;;  %v137_v6 = vld [vmem:[#allocation5 + $0x1b0] sm:$0xff] }
  0x5a   :  { %933 = vmatprep.subr.bf16.mxu1 %v1088_v29  ;;  %v1049_v46 = vld [vmem:[#allocation5 + $0x104] ss:$8 sps:$4 sm:$0xff]   ;;  %v1047_v49 = vld [vmem:[#allocation5 + $0x100] ss:$8 sps:$4 sm:$0xff]   ;;  %v844_v50 = vcombine.high %v82_v47, %v82_v47  ;;  %v1052_v51 = vld [vmem:[#allocation5 + $0x114] ss:$8 sps:$4 sm:$0xff]   ;;  %v900_v8 = vcombine.high %v137_v6, %v137_v6 }
  0x5b   :  { %v1050_v52 = vld [vmem:[#allocation5 + $0x110] ss:$8 sps:$4 sm:$0xff]   ;;  %v1055_v53 = vld [vmem:[#allocation5 + $0x124] ss:$8 sps:$4 sm:$0xff]   ;;  %v1053_v54 = vld [vmem:[#allocation5 + $0x120] ss:$8 sps:$4 sm:$0xff]  }
  0x5c   :  { %458 = vmatpush1.bf16.msra.mxu0 %v1011_v9  ;;  %v1058_v55 = vld [vmem:[#allocation5 + $0x134] ss:$8 sps:$4 sm:$0xff]   ;;  %v1056_v56 = vld [vmem:[#allocation5 + $0x130] ss:$8 sps:$4 sm:$0xff]   ;;  %v1061_v57 = vld [vmem:[#allocation5 + $0x144] ss:$8 sps:$4 sm:$0xff]   ;;  %v899_v9 = vcombine.low %v137_v6, %v137_v6 }
  0x5d   :  { %459 = vmatprep.subr.bf16.mxu0 %v1012_v10  ;;  %934 = vmatpush3.bf16.msra.mxu1 %v1089_v32  ;;  %v1059_v58 = vld [vmem:[#allocation5 + $0x140] ss:$8 sps:$4 sm:$0xff]   ;;  %v1064_v59 = vld [vmem:[#allocation5 + $0x154] ss:$8 sps:$4 sm:$0xff]   ;;  %v1062_v60 = vld [vmem:[#allocation5 + $0x150] ss:$8 sps:$4 sm:$0xff]  }
  0x5e   :  { %935 = vmatprep.subr.bf16.mxu1 %v1090_v33  ;;  %v1067_v61 = vld [vmem:[#allocation5 + $0x164] ss:$8 sps:$4 sm:$0xff]   ;;  %v1065_v62 = vld [vmem:[#allocation5 + $0x160] ss:$8 sps:$4 sm:$0xff]   ;;  %v1070_v63 = vld [vmem:[#allocation5 + $0x174] ss:$8 sps:$4 sm:$0xff]  }
  0x5f   :  { %v1068_v0 = vld [vmem:[#allocation5 + $0x170] ss:$8 sps:$4 sm:$0xff]   ;;  %v1073_v1 = vld [vmem:[#allocation5 + $0x184] ss:$8 sps:$4 sm:$0xff]   ;;  %v1071_v2 = vld [vmem:[#allocation5 + $0x180] ss:$8 sps:$4 sm:$0xff]  }
  0x60   :  { %460 = vmatpush1.bf16.msra.mxu0 %v1014_v11  ;;  %v1076_v3 = vld [vmem:[#allocation5 + $0x194] ss:$8 sps:$4 sm:$0xff]   ;;  %v1074_v4 = vld [vmem:[#allocation5 + $0x190] ss:$8 sps:$4 sm:$0xff]   ;;  %v1079_v5 = vld [vmem:[#allocation5 + $0x1a4] ss:$8 sps:$4 sm:$0xff]   ;;  %v843_v11 = vcombine.low %v82_v47, %v82_v47 }
  0x61   :  { %461 = vmatprep.subr.bf16.mxu0 %v1015_v12  ;;  %936 = vmatpush3.bf16.msra.mxu1 %v1091_v36  ;;  %v1077_v7 = vld [vmem:[#allocation5 + $0x1a0] ss:$8 sps:$4 sm:$0xff]   ;;  %v444_v10 = vsel %vm442_vm1, %v899_v9, 0  ;;  %v1098_v14 = vld [vmem:[#allocation7 + $0x78] sm:$0xff]   ;;  %v1100_v33 = vld [vmem:[#allocation8] sm:$0xff]  }
  0x62   :  { %937 = vmatprep.subr.bf16.mxu1 %v1092_v38  ;;  %v1096_v12 = vld [vmem:[#allocation7 + $0x70] sm:$0xff]   ;;  %v1104_v38 = vld [vmem:[#allocation8 + $0x20] sm:$0xff]  }
  0x63   :  { %v1097_v13 = vld [vmem:[#allocation7 + $0x30] sm:$0xff]  }
  0x64   :  { %462 = vmatpush1.bf16.msra.mxu0 %v1017_v15  ;;  %v1099_v15 = vld [vmem:[#allocation7 + $0x38] sm:$0xff]   ;;  %v1102_v36 = vld [vmem:[#allocation8 + $0x10] sm:$0xff]  }
  0x65   :  { %463 = vmatprep.subr.bf16.mxu0 %v1018_v16  ;;  %938 = vmatpush3.bf16.msra.mxu1 %v1093_v40  ;;  %v1234_v16 = vmov 0.0   ;;  %v1106_v40 = vld [vmem:[#allocation8 + $0x30] sm:$0xff]  }
  0x66   :  { %939 = vmatprep.subr.bf16.mxu1 %v1094_v41  ;;  %v1107_v41 = vld [vmem:[#allocation8 + $0x38] sm:$0xff]  }
  0x68   :  { %464 = vmatpush1.bf16.msra.mxu0 %v1020_v17  ;;  %v140_v17 = vlaneseq }
  0x69   :  { %465 = vmatprep.subr.bf16.mxu0 %v1021_v18  ;;  %940 = vmatpush3.bf16.msra.mxu1 %v1095_v44 }
  0x6a   :  { %941 = vmatprep.subr.bf16.mxu1 %v1096_v12  ;;  %v141_v18 = vshrl.u32 %v140_v17, 7 }
  0x6c   :  { %466 = vmatpush1.bf16.msra.mxu0 %v1023_v19  ;;  %v142_v19 = vsub.s32 0, %v141_v18 }
  0x6d   :  { %467 = vmatprep.subr.bf16.mxu0 %v1024_v20  ;;  %942 = vmatpush3.bf16.msra.mxu1 %v1097_v13  ;;  %v138_v20 = vld [vmem:[%s1354_s2] sm:$0x3] }
  0x6e   :  { %943 = vmatprep.subr.bf16.mxu1 %v1098_v14 }
  0x70   :  { %468 = vmatpush1.bf16.msra.mxu0 %v1026_v21  ;;  %v146_v21 = vsub.s32 1, %v141_v18 }
  0x71   :  { %469 = vmatprep.subr.bf16.mxu0 %v1027_v22  ;;  %944 = vmatpush3.bf16.msra.mxu1 %v1099_v15  ;;  %v143_v22 = vrot.slane %v138_v20, %v142_v19 }
  0x72   :  { %960 = vmatprep.subr.bf16.mxu1 %v1234_v16 }
  0x74   :  { %470 = vmatpush1.bf16.msra.mxu0 %v1029_v23  ;;  %v147_v23 = vrot.slane %v138_v20, %v146_v21 }
  0x75   :  { %471 = vmatprep.subr.bf16.mxu0 %v1030_v25 }
  0x78   :  { %472 = vmatpush1.bf16.msra.mxu0 %v1032_v30 }
  0x79   :  { %473 = vmatprep.subr.bf16.mxu0 %v1033_v31 }
  0x7c   :  { %474 = vmatpush1.bf16.msra.mxu0 %v1035_v34 }
  0x7d   :  { %475 = vmatprep.subr.bf16.mxu0 %v1036_v35  ;;  %v1101_v35 = vld [vmem:[#allocation8 + $0x8] sm:$0xff]  }
  0x80   :  { %476 = vmatpush1.bf16.msra.mxu0 %v1038_v37  ;;  %v1103_v37 = vld [vmem:[#allocation8 + $0x18] sm:$0xff]  }
  0x81   :  { %477 = vmatprep.subr.bf16.mxu0 %v1039_v39  ;;  %v1105_v39 = vld [vmem:[#allocation8 + $0x28] sm:$0xff]  }
  0x84   :  { %478 = vmatpush1.bf16.msra.mxu0 %v1041_v42 }
  0x85   :  { %479 = vmatprep.subr.bf16.mxu0 %v1042_v43  ;;  %v903_v43 = vld [vmem:[%s1356_s4] ss:$0 sm:$0xff]  ;;  %s1196_s4 = scalar_lea.vmem %s831_s8, 128 }
  0x86   :  { %p1197_p4 = scmp.ne.s32.totalorder %s831_s8, %s1196_s4  ;;  %p1202_p6 = scmp.lt.s32.totalorder %s1196_s4, %s1196_s4 }
  0x88   :  { %480 = vmatpush1.bf16.msra.mxu0 %v1044_v45  ;;  %p1203_p7 = por %p1202_p6, %p1201_p5 }
  0x89   :  { %490 = vmatprep.subr.bf16.mxu0 %v1049_v46 }
  0x8a   :  { %p1204_p8 = pnand %p1203_p7, %p1197_p4 }
  0x8b   :  { %482 = vmatmul.mubr.bf16.vlgmr.msra.gmra.mrb[0].mxu0 %v841_v48 }
  0x8c   :  { %491 = vmatpush1.bf16.msra.mxu0 %v1047_v49  ;;  %902 = vmatprep.mubr.msk.bf16.mxu0 %vm438_vm0, %v844_v50 }
  0x8d   :  { %492 = vmatprep.subr.bf16.mxu0 %v1052_v51  ;;  %v920_v51 = vld [vmem:[%s1358_s6] ss:$0 sm:$0xff] }
  0x90   :  { %493 = vmatpush1.bf16.msra.mxu0 %v1050_v52 }
  0x91   :  { %494 = vmatprep.subr.bf16.mxu0 %v1055_v53 }
  0x94   :  { %495 = vmatpush1.bf16.msra.mxu0 %v1053_v54 }
  0x95   :  { %496 = vmatprep.subr.bf16.mxu0 %v1058_v55 }
  0x98   :  { %497 = vmatpush1.bf16.msra.mxu0 %v1056_v56 }
  0x99   :  { %498 = vmatprep.subr.bf16.mxu0 %v1061_v57 }
  0x9c   :  { %499 = vmatpush1.bf16.msra.mxu0 %v1059_v58 }
  0x9d   :  { %500 = vmatprep.subr.bf16.mxu0 %v1064_v59 }
  0xa0   :  { %501 = vmatpush1.bf16.msra.mxu0 %v1062_v60 }
  0xa1   :  { %502 = vmatprep.subr.bf16.mxu0 %v1067_v61 }
  0xa4   :  { %503 = vmatpush1.bf16.msra.mxu0 %v1065_v62 }
  0xa5   :  { %504 = vmatprep.subr.bf16.mxu0 %v1070_v63 }
  0xa8   :  { %505 = vmatpush1.bf16.msra.mxu0 %v1068_v0 }
  0xa9   :  { %506 = vmatprep.subr.bf16.mxu0 %v1073_v1 }
  0xac   :  { %507 = vmatpush1.bf16.msra.mxu0 %v1071_v2 }
  0xad   :  { %508 = vmatprep.subr.bf16.mxu0 %v1076_v3 }
  0xb0   :  { %509 = vmatpush1.bf16.msra.mxu0 %v1074_v4 }
  0xb1   :  { %510 = vmatprep.subr.bf16.mxu0 %v1079_v5 }
  0xb4   :  { %511 = vmatpush1.bf16.msra.mxu0 %v1077_v7 }
  0xb5   :  { %901 = vmatprep.subr.msk.bf16.mxu0 %vm442_vm1, %v900_v8 }
  0xb8   :  { %513 = vmatpush1.bf16.msra.mxu0 %v444_v10 }
  0xbb   :  { %523 = vmatmul.mubr.bf16.vlgmr.msra.gmra.mrb[0].mxu0 %v843_v11 }
 0x18e   :  { %v524_v24 = vpop.f32.mrb[0].mxu0 }
 0x18f   :  { %v980_v25 = vadd.f32 %v524_v24, %v143_v22  ;;  %v526_v26 = vpop.f32.mrb[1].mxu0 }
 0x190   :  { %v981_v27 = vadd.f32 %v526_v26, %v147_v23  ;;  %v528_v28 = vpop.f32.mrb[2].mxu0 }
 0x191   :  { %v531_v29 = vmax.f32 %v980_v25, 0.0  ;;  %v529_v30 = vpop.f32.mrb[3].mxu0 }
 0x192   :  { %v532_v31 = vmax.f32 %v981_v27, 0.0 }
 0x193   :  { %v533_v34 = vpack.c.bf16 %v531_v29, %v531_v29 }
 0x194   :  { %v534_v32 = vpack.c.bf16 %v532_v31, %v532_v31 }
 0x196   :  { %702 = vmatprep.mubr.bf16.mxu1 %v534_v32 }
 0x197   :  { %703 = vmatmul.mubr.bf16.vlgmr.msra.gmra.mrb[0].mxu1 %v533_v34 }
 0x198   :  { %961 = vmatpush3.bf16.msra.mxu1 %v1100_v33  ;;  %976 = vmatprep.mubr.msk.bf16.mxu1 %vm1235_vm2, %v1234_v16 }
 0x199   :  { %962 = vmatprep.subr.bf16.mxu1 %v1234_v16 }
 0x19c   :  { %963 = vmatpush3.bf16.msra.mxu1 %v1101_v35 }
 0x19d   :  { %964 = vmatprep.subr.bf16.mxu1 %v1234_v16 }
 0x1a0   :  { %965 = vmatpush3.bf16.msra.mxu1 %v1102_v36 }
 0x1a1   :  { %966 = vmatprep.subr.bf16.mxu1 %v1234_v16 }
 0x1a4   :  { %967 = vmatpush3.bf16.msra.mxu1 %v1103_v37 }
 0x1a5   :  { %968 = vmatprep.subr.bf16.mxu1 %v1234_v16 }
 0x1a8   :  { %969 = vmatpush3.bf16.msra.mxu1 %v1104_v38 }
 0x1a9   :  { %970 = vmatprep.subr.bf16.mxu1 %v1234_v16 }
 0x1ac   :  { %971 = vmatpush3.bf16.msra.mxu1 %v1105_v39 }
 0x1ad   :  { %972 = vmatprep.subr.bf16.mxu1 %v1234_v16 }
 0x1b0   :  { %973 = vmatpush3.bf16.msra.mxu1 %v1106_v40 }
 0x1b1   :  { %974 = vmatprep.subr.bf16.mxu1 %v1234_v16 }
 0x1b4   :  { %975 = vmatpush3.bf16.msra.mxu1 %v1107_v41 }
 0x26a   :  { %v945_v42 = vpop.f32.mrb[0].mxu1 }
 0x26b   :  { %v946_v44 = vpop.f32.mrb[1].mxu1 }
 0x26c   :  { %v947_v45 = vadd.f32 %v946_v44, %v945_v42  ;;  %v948_v46 = vpop.f32.mrb[2].mxu1 }
 0x26d   :  { %v949_v47 = vpop.f32.mrb[3].mxu1 }
 0x26e   :  { %v705_v48 = vadd.f32 %v947_v45, %v903_v43 }
 0x270   :  { %v710_v49 = vmax.f32 %v705_v48, 0.0 }
 0x272   :  { %v711_v50 = vpack.c.bf16 %v710_v49, %v710_v49 }
 0x274   :  { %977 = vmatmul.mubr.bf16.vlgmr.msra.gmra.mrb[4].mxu1 %v711_v50 }
 0x347   :  { %v817_v52 = vpop.f32.mrb[4].mxu1 }
 0x348   :  { %v818_v53 = vadd.f32 %v920_v51, %v817_v52  ;;  %v978_v54 = vpop.f32.mrb[5].mxu1 }
 0x349   :  { %v820_v55 = vpop.f32.mrb[6].mxu1 }
 0x34a   :  { %823 = vst [vmem:[#allocation10] sm:$0xff] %v818_v53  ;;  %v979_v56 = vpop.f32.mrb[7].mxu1 }
 0x34b   :  { %1207 = shalt.err (!%p1204_p8)
}
 0x34c   :  { %s1208_s6 = scalar_lea.hbm %s1359_s7, 128 }
 0x34d   :  { %p1209_p9 = scmp.ne.s32.totalorder %s1359_s7, %s1208_s6  ;;  %p1212_p10 = scmp.lt.u32.totalorder %s1208_s6, %s1359_s7 }
 0x34f   :  { %p1214_p11 = pnand %p1212_p10, %p1209_p9 }
 0x351   :  { %1217 = shalt.err (!%p1214_p11)
}
 0x352   :  { %833 = dma.vmem_to_hbm [thread:$0]  %s831_s8, 128, %s1359_s7, [#allocation4]  }
 0x353   :  { %1224 = dma.done.wait [#allocation4], 128  }
 0x354   :  { %1225 = vsyncadd [#allocation4], 4294967168 }
 0x355   :  { %837 = vsyncpa [#allocation3], 1 }
 0x356   :  { %838 = vsyncpa [#allocation6], 1 }
 0x357   :  { %839 = vsyncpa [#allocation9], 1 }
 0x358   :  { %840 = vsyncpa [#allocation4], 1 }

</bundles_post_ra>
